<compile_context>
chip_gen: v5e
topology: v5e:2x2
jax: 0.10.0
libtpu: 0.0.40
codegen_flags: <defaults>
</compile_context>

<pallas_src>
import jax
import jax.numpy as jnp
from jax.experimental import pallas as pl
from jax.experimental.pallas import tpu as pltpu


def _round_up(x, m):
    return (x + m - 1) // m * m


def _choose_tile_n(n, emb_dim, max_tile_n=2048, vmem_budget_bytes=24 * 1024 * 1024):
    """Largest TILE_N (multiple of 128) whose live VMEM fits a conservative budget.

    Rough per-row bytes: x f32 double-buffered + bf16 cast copy + hidden f32 +
    double-buffered f32 output.  Budget kept well under v7x's 64 MiB VMEM.
    """
    hidden = max(1, emb_dim // 2)
    per_row = emb_dim * 4 * 2 + emb_dim * 2 + hidden * 4 + 4 * 2
    cap = max(128, (vmem_budget_bytes // per_row) // 128 * 128)
    return max(128, min(max_tile_n, cap, _round_up(n, 128)))


def _mlp_kernel(x_ref, w1_ref, b1_ref, w2_ref, b2_ref, o_ref):
    # hidden = relu(x @ W1 + b1);  out = sum(hidden * w2_row, -1) + b2
    x = x_ref[...]                                    # (TILE_N, emb_dim) f32
    w1 = w1_ref[...]                                  # (emb_dim, hidden) f32
    # bf16 MXU operands, f32 accumulation (kernel is HBM-stream bound anyway).
    h = jnp.dot(x.astype(jnp.bfloat16), w1.astype(jnp.bfloat16),
                preferred_element_type=jnp.float32)   # (TILE_N, hidden)
    h = jnp.maximum(h + b1_ref[...], 0.0)             # bias + ReLU in f32 (v5e-safe)
    # Output width is 1 -> VPU multiply + lane reduction; skip the MXU entirely.
    o = jnp.sum(h * w2_ref[...], axis=-1) + b2_ref[0, 0]   # (TILE_N,)
    # Lane-dense store: (1, TILE_N//128, 128) slab, no masked partial stores.
    o_ref[...] = o.reshape(o_ref.shape).astype(o_ref.dtype)


def linear_predictor(emb, w1, b1, w2, b2, *, max_tile_n=2048):
    """emb: (N, emb_dim) f32; returns (N,) f32 — matches torch.squeeze(..., dim=1).

    Weights are stored pre-transposed vs. torch: W1 (emb_dim, hidden),
    b1 (1, hidden), W2 (hidden, 1), b2 (1, 1).
    """
    n, emb_dim = emb.shape
    hidden = w1.shape[1]

    tile_n = _choose_tile_n(n, emb_dim, max_tile_n=max_tile_n)
    assert tile_n % 128 == 0
    n_pad = _round_up(n, tile_n)
    if n_pad != n:
        emb = jnp.pad(emb, ((0, n_pad - n), (0, 0)))
    g = n_pad // tile_n
    rows = tile_n // 128

    w2_row = w2.reshape(1, hidden).astype(jnp.float32)   # second layer as a row
    b2_s = b2.reshape(1, 1).astype(jnp.float32)          # SMEM scalar

    out3d = pl.pallas_call(
        _mlp_kernel,
        out_shape=jax.ShapeDtypeStruct((g, rows, 128), jnp.float32),
        grid=(g,),
        in_specs=[
            # Streamed input: double-buffered (TILE_N, emb_dim) tiles.
            pl.BlockSpec((tile_n, emb_dim), lambda i: (i, 0)),
            # Weights / biases: VMEM-resident, DMA'd once.
            pl.BlockSpec((emb_dim, hidden), lambda i: (0, 0)),
            pl.BlockSpec((1, hidden), lambda i: (0, 0)),
            pl.BlockSpec((1, hidden), lambda i: (0, 0)),
            # b2: scalar in SMEM.
            pl.BlockSpec(memory_space=pltpu.MemorySpace.SMEM),
        ],
        out_specs=pl.BlockSpec((1, rows, 128), lambda i: (i, 0, 0)),
        compiler_params=pltpu.CompilerParams(
            dimension_semantics=("parallel",),        # shard batch grid across TCs (v7x)
            vmem_limit_bytes=48 * 1024 * 1024,        # explicit, safe on 64 MiB v7x VMEM
        ),
    )(emb, w1, b1, w2_row, b2_s)

    return out3d.reshape(-1)[:n]


def init_params(key, emb_dim):
    """Deterministic synthetic init (Kaiming-uniform-ish like nn.Linear)."""
    hidden = emb_dim // 2
    k1, k2, k3, k4 = jax.random.split(key, 4)
    bound1 = 1.0 / (emb_dim ** 0.5)
    bound2 = 1.0 / (hidden ** 0.5)
    # stored pre-transposed relative to torch's (out_features, in_features)
    w1 = jax.random.uniform(k1, (emb_dim, hidden), jnp.float32, -bound1, bound1)
    b1 = jax.random.uniform(k2, (1, hidden), jnp.float32, -bound1, bound1)
    w2 = jax.random.uniform(k3, (hidden, 1), jnp.float32, -bound2, bound2)
    b2 = jax.random.uniform(k4, (1, 1), jnp.float32, -bound2, bound2)
    return w1, b1, w2, b2


def _reference(emb, w1, b1, w2, b2):
    h = jnp.maximum(emb @ w1 + b1, 0.0)
    return jnp.squeeze(h @ w2 + b2, axis=1)


if __name__ == "__main__":
    key = jax.random.PRNGKey(0)
    k_x, k_p, k_x2 = jax.random.split(key, 3)

    # Small demo shapes consistent with the module.
    N, EMB_DIM = 8, 32
    emb = jax.random.normal(k_x, (N, EMB_DIM), jnp.float32)
    w1, b1, w2, b2 = init_params(k_p, EMB_DIM)

    out = linear_predictor(emb, w1, b1, w2, b2)
    jax.block_until_ready(out)
    ref = _reference(emb, w1, b1, w2, b2)
    assert out.shape == (N,), out.shape
    # bf16 MXU operands -> allow small numerical slack vs the pure-f32 reference.
    assert jnp.allclose(out, ref, atol=2e-2, rtol=2e-2), "mismatch vs reference (small)"

    # Second check: exercise grid > 1 tile + row padding (N not a tile multiple).
    N2 = 300
    emb2 = jax.random.normal(k_x2, (N2, EMB_DIM), jnp.float32)
    out2 = linear_predictor(emb2, w1, b1, w2, b2, max_tile_n=128)  # grid of 3 tiles
    jax.block_until_ready(out2)
    ref2 = _reference(emb2, w1, b1, w2, b2)
    assert out2.shape == (N2,), out2.shape
    assert jnp.allclose(out2, ref2, atol=2e-2, rtol=2e-2), "mismatch vs reference (tiled)"

    print("KERNEL_OK")
</pallas_src>

<mosaic_0001>
module attributes {stable_mosaic.version = 11 : i64} {
  func.func @_mlp_kernel(%arg0: i32, %arg1: memref<128x32xf32, #tpu.memory_space<vmem>>, %arg2: memref<32x16xf32, #tpu.memory_space<vmem>>, %arg3: memref<1x16xf32, #tpu.memory_space<vmem>>, %arg4: memref<1x16xf32, #tpu.memory_space<vmem>>, %arg5: memref<1x1xf32, #tpu.memory_space<smem>>, %arg6: memref<1x1x128xf32, #tpu.memory_space<vmem>>) attributes {dimension_semantics = [#tpu.dimension_semantics<parallel>], iteration_bounds = array<i64: 1>, scalar_prefetch = 0 : i64, scratch_operands = 0 : i64, tpu.core_type = #tpu.core_type<tc>, window_params = [{transform_indices = @transform_0, window_bounds = array<i64: 128, 32>}, {pipeline_mode = #tpu.pipeline_mode<synchronous>, transform_indices = @transform_1, window_bounds = array<i64: 32, 16>}, {pipeline_mode = #tpu.pipeline_mode<synchronous>, transform_indices = @transform_2, window_bounds = array<i64: 1, 16>}, {pipeline_mode = #tpu.pipeline_mode<synchronous>, transform_indices = @transform_3, window_bounds = array<i64: 1, 16>}, {transform_indices = @transform_4, window_bounds = array<i64: 1, 1>}, {transform_indices = @transform_5, window_bounds = array<i64: 1, 1, 128>}]} {
    %c0 = arith.constant 0 : index
    %c0_0 = arith.constant 0 : index
    %0 = vector.load %arg1[%c0, %c0_0] : memref<128x32xf32, #tpu.memory_space<vmem>>, vector<128x32xf32>
    %c0_1 = arith.constant 0 : index
    %c0_2 = arith.constant 0 : index
    %1 = vector.load %arg2[%c0_1, %c0_2] : memref<32x16xf32, #tpu.memory_space<vmem>>, vector<32x16xf32>
    %2 = arith.truncf %0 : vector<128x32xf32> to vector<128x32xbf16>
    %3 = arith.truncf %1 : vector<32x16xf32> to vector<32x16xbf16>
    %cst = arith.constant dense<0.000000e+00> : vector<128x16xf32>
    %4 = tpu.matmul %2, %3, %cst {dimension_numbers = #tpu.dot_dimension_numbers<[1], [0], [0], [1], [0, 0, 1, 1], [], []>} : vector<128x32xbf16>, vector<32x16xbf16>, vector<128x16xf32> -> vector<128x16xf32>
    %c0_3 = arith.constant 0 : index
    %c0_4 = arith.constant 0 : index
    %5 = vector.load %arg3[%c0_3, %c0_4] : memref<1x16xf32, #tpu.memory_space<vmem>>, vector<1x16xf32>
    %6 = vector.broadcast %5 : vector<1x16xf32> to vector<128x16xf32>
    %7 = arith.addf %4, %6 : vector<128x16xf32>
    %cst_5 = arith.constant 0.000000e+00 : f32
    %8 = vector.broadcast %cst_5 : f32 to vector<128x16xf32>
    %9 = arith.maximumf %7, %8 : vector<128x16xf32>
    %c0_6 = arith.constant 0 : index
    %c0_7 = arith.constant 0 : index
    %10 = vector.load %arg4[%c0_6, %c0_7] : memref<1x16xf32, #tpu.memory_space<vmem>>, vector<1x16xf32>
    %11 = vector.broadcast %10 : vector<1x16xf32> to vector<128x16xf32>
    %12 = arith.mulf %9, %11 : vector<128x16xf32>
    %cst_8 = arith.constant dense<0.000000e+00> : vector<128xf32>
    %13 = vector.multi_reduction <add>, %12, %cst_8 [1] : vector<128x16xf32> to vector<128xf32>
    %c0_9 = arith.constant 0 : index
    %c0_10 = arith.constant 0 : index
    %14 = memref.load %arg5[%c0_9, %c0_10] : memref<1x1xf32, #tpu.memory_space<smem>>
    %15 = vector.broadcast %14 : f32 to vector<128xf32>
    %16 = arith.addf %13, %15 : vector<128xf32>
    %17 = vector.shape_cast %16 : vector<128xf32> to vector<1x1x128xf32>
    %c0_11 = arith.constant 0 : index
    %c0_12 = arith.constant 0 : index
    %c0_13 = arith.constant 0 : index
    %18 = vector.load %arg6[%c0_11, %c0_12, %c0_13] : memref<1x1x128xf32, #tpu.memory_space<vmem>>, vector<1x1x128xf32>
    tpu.vector_store %arg6[%c0_11, %c0_12, %c0_13], %17 {strides = array<i32>} : memref<1x1x128xf32, #tpu.memory_space<vmem>>, vector<1x1x128xf32>,
    return
  }
  func.func @transform_0(%arg0: i32) -> (i32, i32) {
    %c0_i32 = arith.constant 0 : i32
    %c0_i32_0 = arith.constant 0 : i32
    return %arg0, %c0_i32 : i32, i32
  }
  func.func @transform_1(%arg0: i32) -> (i32, i32) {
    %c0_i32 = arith.constant 0 : i32
    %c0_i32_0 = arith.constant 0 : i32
    %c0_i32_1 = arith.constant 0 : i32
    return %c0_i32, %c0_i32_0 : i32, i32
  }
  func.func @transform_2(%arg0: i32) -> (i32, i32) {
    %c0_i32 = arith.constant 0 : i32
    %c0_i32_0 = arith.constant 0 : i32
    %c0_i32_1 = arith.constant 0 : i32
    return %c0_i32, %c0_i32_0 : i32, i32
  }
  func.func @transform_3(%arg0: i32) -> (i32, i32) {
    %c0_i32 = arith.constant 0 : i32
    %c0_i32_0 = arith.constant 0 : i32
    %c0_i32_1 = arith.constant 0 : i32
    return %c0_i32, %c0_i32_0 : i32, i32
  }
  func.func @transform_4(%arg0: i32) -> (i32, i32) {
    %c0_i32 = arith.constant 0 : i32
    %c0_i32_0 = arith.constant 0 : i32
    %c0_i32_1 = arith.constant 0 : i32
    return %c0_i32, %c0_i32_0 : i32, i32
  }
  func.func @transform_5(%arg0: i32) -> (i32, i32, i32) {
    %c0_i32 = arith.constant 0 : i32
    %c0_i32_0 = arith.constant 0 : i32
    %c0_i32_1 = arith.constant 0 : i32
    return %arg0, %c0_i32, %c0_i32_0 : i32, i32, i32
  }
}

</mosaic_0001>

<bundles_post_ra>
// kernel: tpu_custom_call.1
= control target key start
LH: loop header
LB: loop body
LE: loop exit
PB: predicated region body
PF: predicated region fallthrough
CT: control target
= control target key end

     0   :  { %vm57_vm0 = vcmask 261120   ;;  %s573_s0 = inlined_call_operand.vmem [shape: f32[128,32], index: 0, kind: input, shape index: {}]   ;;  %s574_s1 = inlined_call_operand.vmem [shape: f32[32,16], index: 1, kind: input, shape index: {}]   ;;  %s575_s2 = inlined_call_operand.vmem [shape: f32[1,16], index: 2, kind: input, shape index: {}]   ;;  %s576_s3 = inlined_call_operand.vmem [shape: f32[1,16], index: 3, kind: input, shape index: {}]   ;;  %s577_s4 = inlined_call_operand.<no memory space> [shape: f32[1,1], index: 4, kind: input, shape index: {}]   ;;  %s578_s5 = inlined_call_operand.hbm [shape: f32[1,1,128], index: 5, kind: output, shape index: {}]  }
   0x1   :  { %v41_v0 = vld [vmem:[%s574_s1 + $0x10] sm:$0xff]  ;;  %v42_v1 = vld [vmem:[%s574_s1 + $0x18] sm:$0xff]  ;;  %v39_v2 = vld [vmem:[%s574_s1] sm:$0xff] }
   0x2   :  { %v52_v3 = vpack.c.bf16 %v42_v1, %v41_v0  ;;  %v40_v4 = vld [vmem:[%s574_s1 + $0x8] sm:$0xff]  ;;  %v23_v5 = vld [vmem:[%s573_s0] sm:$0xff] }
   0x3   :  { %v24_v6 = vld [vmem:[%s573_s0 + $0x8] sm:$0xff]  ;;  %v51_v7 = vpack.c.bf16 %v40_v4, %v39_v2  ;;  %v27_v8 = vld [vmem:[%s573_s0 + $0x20] sm:$0xff] }
   0x4   :  { %88 = vmatpush.bf16.msra.mxu0 %v52_v3  ;;  %339 = vmatpush.bf16.msra.mxu1 %v52_v3  ;;  %v28_v9 = vld [vmem:[%s573_s0 + $0x28] sm:$0xff]  ;;  %v31_v10 = vld [vmem:[%s573_s0 + $0x40] sm:$0xff]  ;;  %v43_v14 = vpack.c.bf16 %v24_v6, %v23_v5 }
   0x5   :  { %340 = vmatpush.bf16.msra.mxu2 %v52_v3  ;;  %v32_v11 = vld [vmem:[%s573_s0 + $0x48] sm:$0xff]  ;;  %341 = vmatpush.bf16.msra.mxu3 %v52_v3  ;;  %v35_v12 = vld [vmem:[%s573_s0 + $0x60] sm:$0xff]  ;;  %v45_v15 = vpack.c.bf16 %v28_v9, %v27_v8 }
   0x6   :  { %v36_v13 = vld [vmem:[%s573_s0 + $0x68] sm:$0xff]  ;;  %v47_v16 = vpack.c.bf16 %v32_v11, %v31_v10 }
   0x7   :  { %v49_v17 = vpack.c.bf16 %v36_v13, %v35_v12 }
   0x8   :  { %89 = vmatpush.bf16.msra.mxu0 %v51_v7  ;;  %342 = vmatpush.bf16.msra.mxu1 %v51_v7 }
   0x9   :  { %11 = vsyncpa [#allocation4], 0  ;;  %343 = vmatpush.bf16.msra.mxu2 %v51_v7  ;;  %344 = vmatpush.bf16.msra.mxu3 %v51_v7  ;;  %v25_v18 = vld [vmem:[%s573_s0 + $0x10] sm:$0xff]  ;;  %v26_v19 = vld [vmem:[%s573_s0 + $0x18] sm:$0xff]  ;;  %vm167_vm1 = vcmask 130048   ;;  %vm255_vm2 = vcmask 130112  }
   0xa   :  { %v33_v20 = vld [vmem:[%s573_s0 + $0x50] sm:$0xff]  ;;  %v30_v22 = vld [vmem:[%s573_s0 + $0x38] sm:$0xff]  ;;  %v44_v26 = vpack.c.bf16 %v26_v19, %v25_v18  ;;  %v476_v30 = vld [vmem:[%s575_s2] ss:$0 sm:$0xff]  ;;  %vm259_vm3 = vcmask 195712   ;;  %vm263_vm4 = vcmask 261312  }
   0xb   :  { %331 = vmatmul.msk.bf16.vlgmr.msra.gmra.mxu0 %vm57_vm0, %v43_v14  ;;  %333 = vmatmul.msk.bf16.vlgmr.msra.gmra.mxu1 %vm57_vm0, %v45_v15  ;;  %v29_v21 = vld [vmem:[%s573_s0 + $0x30] sm:$0xff]  ;;  %v34_v23 = vld [vmem:[%s573_s0 + $0x58] sm:$0xff]  ;;  %v483_v35 = vld [vmem:[%s576_s3] ss:$0 sm:$0xff]  ;;  %vm267_vm5 = vcmask 326912   ;;  %vm271_vm6 = vcmask 392512  }
   0xc   :  { %335 = vmatmul.msk.bf16.vlgmr.msra.gmra.mxu2 %vm57_vm0, %v47_v16  ;;  %337 = vmatmul.msk.bf16.vlgmr.msra.gmra.mxu3 %vm57_vm0, %v49_v17  ;;  %v37_v24 = vld [vmem:[%s573_s0 + $0x70] sm:$0xff]  ;;  %v38_v25 = vld [vmem:[%s573_s0 + $0x78] sm:$0xff]  ;;  %v46_v27 = vpack.c.bf16 %v30_v22, %v29_v21  ;;  %v48_v28 = vpack.c.bf16 %v34_v23, %v33_v20  ;;  %vm275_vm7 = vcmask 458112   ;;  %vm279_vm8 = vcmask 523712   ;;  %s322_s12 = sshll.u32 %s578_s5, 4  ;;  %s323_s12 = int_to_ptr.hbm [resolvable:$true] %s322_s12 }
   0xd   :  { %v50_v29 = vpack.c.bf16 %v38_v25, %v37_v24  ;;  %vm283_vm9 = vcmask 589312   ;;  %vm287_vm10 = vcmask 654912   ;;  %vm291_vm11 = vcmask 720512  }
   0xe   :  { %vm295_vm12 = vcmask 786112   ;;  %vm299_vm13 = vcmask 851712   ;;  %vm303_vm14 = vcmask 917312   ;;  %vm307_vm15 = vcmask 982912  }
  0x1b   :  { %332 = vmatmul.msk.bf16.gmra.mxu0 %vm57_vm0, %v44_v26  ;;  %334 = vmatmul.msk.bf16.gmra.mxu1 %vm57_vm0, %v46_v27 }
  0x1c   :  { %336 = vmatmul.msk.bf16.gmra.mxu2 %vm57_vm0, %v48_v28  ;;  %338 = vmatmul.msk.bf16.gmra.mxu3 %vm57_vm0, %v50_v29  ;;  %vm311_vm0 = vcmask 1048512  }
  0x88   :  { %v91_v31 = vpop.f32.mrf.mxu0  ;;  %v101_v32 = vpop.f32.mrf.mxu1 }
  0x89   :  { %v92_v33 = vadd.f32 %v476_v30, %v91_v31  ;;  %v102_v34 = vadd.f32 %v476_v30, %v101_v32 }
  0x8b   :  { %v131_v36 = vmax.f32 %v92_v33, 0.0  ;;  %v135_v37 = vmax.f32 %v102_v34, 0.0 }
  0x8d   :  { %v155_v38 = vmul.f32 %v483_v35, %v135_v37  ;;  %v151_v39 = vmul.f32 %v483_v35, %v131_v36 }
  0x8f   :  { %v111_v40 = vpop.f32.mrf.mxu2  ;;  %v180_v41 = vsel %vm167_vm1, %v155_v38, 0.0  ;;  %v168_v42 = vsel %vm167_vm1, %v151_v39, 0.0  ;;  %v121_v43 = vpop.f32.mrf.mxu3 }
  0x90   :  { %v112_v44 = vadd.f32 %v476_v30, %v111_v40  ;;  %181 = vadd.xlane.f32.xlu2 %v180_v41  ;;  %v93_v45 = vpop.f32.mrf.mxu0  ;;  %169 = vadd.xlane.f32.xlu0 %v168_v42  ;;  %v103_v46 = vpop.f32.mrf.mxu1  ;;  %v122_v15 = vadd.f32 %v476_v30, %v121_v43 }
  0x91   :  { %v94_v47 = vadd.f32 %v476_v30, %v93_v45  ;;  %v104_v48 = vadd.f32 %v476_v30, %v103_v46 }
  0x92   :  { %v139_v49 = vmax.f32 %v112_v44, 0.0  ;;  %v143_v22 = vmax.f32 %v122_v15, 0.0 }
  0x93   :  { %v132_v50 = vmax.f32 %v94_v47, 0.0  ;;  %v136_v52 = vmax.f32 %v104_v48, 0.0 }
  0x94   :  { %v159_v51 = vmul.f32 %v483_v35, %v139_v49  ;;  %v163_v33 = vmul.f32 %v483_v35, %v143_v22 }
  0x95   :  { %v152_v53 = vmul.f32 %v483_v35, %v132_v50  ;;  %v156_v62 = vmul.f32 %v483_v35, %v136_v52 }
  0x96   :  { %v192_v54 = vsel %vm167_vm1, %v159_v51, 0.0  ;;  %v204_v39 = vsel %vm167_vm1, %v163_v33, 0.0 }
  0x97   :  { %v113_v55 = vpop.f32.mrf.mxu2  ;;  %v171_v56 = vsel %vm167_vm1, %v152_v53, 0.0  ;;  %v123_v57 = vpop.f32.mrf.mxu3  ;;  %v183_v3 = vsel %vm167_vm1, %v156_v62, 0.0 }
  0x98   :  { %v114_v58 = vadd.f32 %v476_v30, %v113_v55  ;;  %193 = vadd.xlane.f32.xlu2 %v192_v54  ;;  %v96_v59 = vpop.f32.mrf.mxu0  ;;  %172 = vadd.xlane.f32.xlu0 %v171_v56  ;;  %v106_v60 = vpop.f32.mrf.mxu1  ;;  %v124_v42 = vadd.f32 %v476_v30, %v123_v57  ;;  %v250_v55 = vlaneseq }
  0x99   :  { %v97_v61 = vadd.f32 %v476_v30, %v96_v59  ;;  %v107_v0 = vadd.f32 %v476_v30, %v106_v60 }
  0x9a   :  { %v140_v63 = vmax.f32 %v114_v58, 0.0  ;;  %v144_v46 = vmax.f32 %v124_v42, 0.0  ;;  %v531_v57 = vand.u32 127, %v250_v55  ;;  %v536_v58 = vstv %s577_s4  ;;  %s374_s4 = smov [#allocation3]  }
  0x9b   :  { %v133_v1 = vmax.f32 %v97_v61, 0.0  ;;  %v137_v5 = vmax.f32 %v107_v0, 0.0  ;;  %s320_s9 = sshll.u32 %s374_s4, 4  ;;  %s321_s9 = int_to_ptr.vmem [resolvable:$true] %s320_s9 }
  0x9c   :  { %v160_v2 = vmul.f32 %v483_v35, %v140_v63  ;;  %v164_v48 = vmul.f32 %v483_v35, %v144_v46  ;;  %v257_v60 = vadd.s32 4294967280, %v531_v57  ;;  %v277_v22 = vadd.s32 4294967240, %v531_v57 }
  0x9d   :  { %v153_v4 = vmul.f32 %v483_v35, %v133_v1  ;;  %v157_v13 = vmul.f32 %v483_v35, %v137_v5 }
  0x9e   :  { %v195_v11 = vsel %vm167_vm1, %v160_v2, 0.0  ;;  %v207_v49 = vsel %vm167_vm1, %v164_v48, 0.0  ;;  %v261_v2 = vadd.s32 4294967272, %v531_v57 }
  0x9f   :  { %v116_v6 = vpop.f32.mrf.mxu2  ;;  %v174_v7 = vsel %vm167_vm1, %v153_v4, 0.0  ;;  %v126_v8 = vpop.f32.mrf.mxu3  ;;  %v186_v18 = vsel %vm167_vm1, %v157_v13, 0.0 }
  0xa0   :  { %v117_v9 = vadd.f32 %v476_v30, %v116_v6  ;;  %184 = vadd.xlane.f32.xlu2 %v183_v3  ;;  %v98_v10 = vpop.f32.mrf.mxu0  ;;  %175 = vadd.xlane.f32.xlu1 %v174_v7  ;;  %v108_v24 = vpop.f32.mrf.mxu1  ;;  %v127_v25 = vadd.f32 %v476_v30, %v126_v8  ;;  %v265_v3 = vadd.s32 4294967264, %v531_v57 }
  0xa1   :  { %196 = vadd.xlane.f32.xlu0 %v195_v11  ;;  %v99_v14 = vadd.f32 %v476_v30, %v98_v10  ;;  %v109_v28 = vadd.f32 %v476_v30, %v108_v24 }
  0xa2   :  { %v141_v12 = vmax.f32 %v117_v9, 0.0  ;;  %v145_v31 = vmax.f32 %v127_v25, 0.0  ;;  %v269_v9 = vadd.s32 4294967256, %v531_v57  ;;  %v285_v25 = vadd.s32 4294967224, %v531_v57 }
  0xa3   :  { %v134_v19 = vmax.f32 %v99_v14, 0.0  ;;  %v138_v37 = vmax.f32 %v109_v28, 0.0 }
  0xa4   :  { %v161_v16 = vmul.f32 %v483_v35, %v141_v12  ;;  %v165_v40 = vmul.f32 %v483_v35, %v145_v31  ;;  %v289_v31 = vadd.s32 4294967216, %v531_v57 }
  0xa5   :  { %v154_v29 = vmul.f32 %v483_v35, %v134_v19  ;;  %v158_v43 = vmul.f32 %v483_v35, %v138_v37 }
  0xa6   :  { %v198_v17 = vsel %vm167_vm1, %v161_v16, 0.0  ;;  %v210_v44 = vsel %vm167_vm1, %v165_v40, 0.0 }
  0xa7   :  { %v118_v20 = vpop.f32.mrf.mxu2  ;;  %v128_v21 = vpop.f32.mrf.mxu3  ;;  %v177_v38 = vsel %vm167_vm1, %v154_v29, 0.0  ;;  %v189_v47 = vsel %vm167_vm1, %v158_v43, 0.0 }
  0xa8   :  { %v119_v23 = vadd.f32 %v476_v30, %v118_v20  ;;  %199 = vadd.xlane.f32.xlu1 %v198_v17  ;;  %v129_v27 = vadd.f32 %v476_v30, %v128_v21  ;;  %v273_v17 = vadd.s32 4294967248, %v531_v57 }
  0xa9   :  { %187 = vadd.xlane.f32.xlu0 %v186_v18 }
  0xaa   :  { %v142_v26 = vmax.f32 %v119_v23, 0.0  ;;  %v146_v36 = vmax.f32 %v129_v27, 0.0  ;;  %v281_v23 = vadd.s32 4294967232, %v531_v57 }
  0xac   :  { %v162_v32 = vmul.f32 %v483_v35, %v142_v26  ;;  %v166_v41 = vmul.f32 %v483_v35, %v146_v36  ;;  %v253_v35 = vadd.s32 4294967288, %v531_v57 }
  0xae   :  { %v201_v34 = vsel %vm167_vm1, %v162_v32, 0.0  ;;  %v213_v45 = vsel %vm167_vm1, %v166_v41, 0.0  ;;  %v297_v41 = vadd.s32 4294967200, %v531_v57 }
  0xaf   :  { %202 = vadd.xlane.f32.xlu2 %v201_v34  ;;  %v293_v34 = vadd.s32 4294967208, %v531_v57 }
  0xb0   :  { %178 = vadd.xlane.f32.xlu1 %v177_v38 }
  0xb1   :  { %205 = vadd.xlane.f32.xlu0 %v204_v39 }
  0xb7   :  { %211 = vadd.xlane.f32.xlu2 %v210_v44 }
  0xb8   :  { %190 = vadd.xlane.f32.xlu1 %v189_v47 }
  0xb9   :  { %214 = vadd.xlane.f32.xlu0 %v213_v45 }
  0xc0   :  { %208 = vadd.xlane.f32.xlu1 %v207_v49 }
 0x103   :  { %v170_v50 = vpop.xlane.xlu0 %169  ;;  %v182_v30 = vpop.xlane.xlu2 %181 }
 0x104   :  { %v218_v63 = vadd.f32 %v536_v58, %v170_v50  ;;  %v222_v4 = vadd.f32 %v536_v58, %v182_v30  ;;  %v301_v50 = vadd.s32 4294967192, %v531_v57 }
 0x106   :  { %v252_v7 = vperm.slane %v218_v63, %v531_v57  ;;  %v266_v13 = vperm.slane %v222_v4, %v265_v3 }
 0x10b   :  { %v173_v51 = vpop.xlane.xlu0 %172  ;;  %v194_v54 = vpop.xlane.xlu2 %193 }
 0x10c   :  { %v219_v59 = vadd.f32 %v536_v58, %v173_v51  ;;  %v226_v24 = vadd.f32 %v536_v58, %v194_v54  ;;  %v305_v51 = vadd.s32 4294967184, %v531_v57 }
 0x10e   :  { %v254_v1 = vperm.slane %v219_v59, %v253_v35  ;;  %v282_v38 = vperm.slane %v226_v24, %v281_v23 }
 0x110   :  { %v256_v10 = vsel %vm255_vm2, %v254_v1, %v252_v7 }
 0x113   :  { %v176_v52 = vpop.xlane.xlu1 %175  ;;  %v185_v0 = vpop.xlane.xlu2 %184 }
 0x114   :  { %v197_v53 = vpop.xlane.xlu0 %196  ;;  %v220_v61 = vadd.f32 %v536_v58, %v176_v52  ;;  %v223_v11 = vadd.f32 %v536_v58, %v185_v0  ;;  %v309_v52 = vadd.s32 4294967176, %v531_v57 }
 0x115   :  { %v227_v27 = vadd.f32 %v536_v58, %v197_v53 }
 0x116   :  { %v258_v5 = vperm.slane %v220_v61, %v257_v60  ;;  %v270_v21 = vperm.slane %v223_v11, %v269_v9 }
 0x117   :  { %v286_v40 = vperm.slane %v227_v27, %v285_v25 }
 0x118   :  { %v260_v14 = vsel %vm259_vm3, %v258_v5, %v256_v10 }
 0x11b   :  { %v200_v56 = vpop.xlane.xlu1 %199 }
 0x11c   :  { %v188_v62 = vpop.xlane.xlu0 %187  ;;  %v228_v32 = vadd.f32 %v536_v58, %v200_v56 }
 0x11d   :  { %v224_v18 = vadd.f32 %v536_v58, %v188_v62 }
 0x11e   :  { %v290_v44 = vperm.slane %v228_v32, %v289_v31 }
 0x11f   :  { %v274_v33 = vperm.slane %v224_v18, %v273_v17 }
 0x122   :  { %v203_v15 = vpop.xlane.xlu2 %202 }
 0x123   :  { %v179_v6 = vpop.xlane.xlu1 %178  ;;  %v229_v36 = vadd.f32 %v536_v58, %v203_v15 }
 0x124   :  { %v221_v8 = vadd.f32 %v536_v58, %v179_v6  ;;  %v206_v20 = vpop.xlane.xlu0 %205 }
 0x125   :  { %v230_v45 = vadd.f32 %v536_v58, %v206_v20  ;;  %v294_v48 = vperm.slane %v229_v36, %v293_v34 }
 0x126   :  { %v262_v12 = vperm.slane %v221_v8, %v261_v2 }
 0x127   :  { %v298_v59 = vperm.slane %v230_v45, %v297_v41 }
 0x128   :  { %v264_v16 = vsel %vm263_vm4, %v262_v12, %v260_v14 }
 0x129   :  { %v268_v19 = vsel %vm267_vm5, %v266_v13, %v264_v16 }
 0x12a   :  { %v272_v29 = vsel %vm271_vm6, %v270_v21, %v268_v19  ;;  %v212_v43 = vpop.xlane.xlu2 %211 }
 0x12b   :  { %v191_v26 = vpop.xlane.xlu1 %190  ;;  %v276_v39 = vsel %vm275_vm7, %v274_v33, %v272_v29  ;;  %v232_v30 = vadd.f32 %v536_v58, %v212_v43 }
 0x12c   :  { %v225_v28 = vadd.f32 %v536_v58, %v191_v26  ;;  %v215_v47 = vpop.xlane.xlu0 %214 }
 0x12d   :  { %v233_v55 = vadd.f32 %v536_v58, %v215_v47  ;;  %v306_v61 = vperm.slane %v232_v30, %v305_v51 }
 0x12e   :  { %v278_v37 = vperm.slane %v225_v28, %v277_v22 }
 0x12f   :  { %v310_v62 = vperm.slane %v233_v55, %v309_v52 }
 0x130   :  { %v280_v42 = vsel %vm279_vm8, %v278_v37, %v276_v39 }
 0x131   :  { %v284_v46 = vsel %vm283_vm9, %v282_v38, %v280_v42 }
 0x132   :  { %v288_v49 = vsel %vm287_vm10, %v286_v40, %v284_v46 }
 0x133   :  { %v209_v53 = vpop.xlane.xlu1 %208  ;;  %v292_v54 = vsel %vm291_vm11, %v290_v44, %v288_v49 }
 0x134   :  { %v231_v56 = vadd.f32 %v536_v58, %v209_v53  ;;  %v296_v35 = vsel %vm295_vm12, %v294_v48, %v292_v54 }
 0x135   :  { %v300_v57 = vsel %vm299_vm13, %v298_v59, %v296_v35 }
 0x136   :  { %v302_v60 = vperm.slane %v231_v56, %v301_v50 }
 0x138   :  { %v304_v63 = vsel %vm303_vm14, %v302_v60, %v300_v57 }
 0x139   :  { %v308_v0 = vsel %vm307_vm15, %v306_v61, %v304_v63 }
 0x13a   :  { %v312_v58 = vsel %vm311_vm0, %v310_v62, %v308_v0 }
 0x13b   :  { %314 = vst [vmem:[#allocation3] sm:$0x1] %v312_v58 }
 0x13c   :  { %325 = dma.vmem_to_hbm [thread:$0]  %s321_s9, 16, %s323_s12, [#allocation4]  }
 0x13d   :  { %372 = dma.done.wait [#allocation4], 16  }
 0x13e   :  { %373 = vsyncadd [#allocation4], 4294967280 }
 0x13f   :  { %330 = vsyncpa [#allocation4], 1 }

</bundles_post_ra>
